<compile_context>
chip_gen: v7x
topology: tpu7x:2x2x1
jax: 0.10.0
libtpu: 0.0.40
codegen_flags: <defaults>
</compile_context>

<pallas_src>
import functools

import jax
import jax.numpy as jnp
from jax.experimental import pallas as pl
from jax.experimental.pallas import tpu as pltpu

INPUT_DIM = 50
HIDDEN_DIM = 20
OUTPUT_DIM = 10

LANE = 128
SUBLANE = 8
HIDDEN_PAD = LANE    # 20 -> 128: lane-dense intermediate / K of second matmul
OUTPUT_PAD = LANE    # padded w2/b2 columns (resident, tiny); HBM output stays 10 wide
DEFAULT_BLOCK_BATCH = 2048


def _round_up(n, m):
    return -(-n // m) * m


def _pad_to(arr, shape):
    pads = [(0, t - s) for s, t in zip(arr.shape, shape)]
    return jnp.pad(arr, pads)


def _fnn_kernel(x_ref, w1_ref, b1_ref, w2_ref, b2_ref, o_ref):
    # fc1: (tb, 50) @ (50, 128), f32 accumulation on the MXU.
    x = x_ref[...].astype(jnp.float32)
    h = jnp.dot(x, w1_ref[...], preferred_element_type=jnp.float32)
    h = h + b1_ref[...]
    # Softplus, PyTorch semantics (beta=1, threshold=20 -> linear above 20).
    h = jnp.where(h > 20.0, h, jnp.log1p(jnp.exp(jnp.minimum(h, 20.0))))
    # fc2: (tb, 128) @ (128, 128) + bias; only the 10 real columns are stored.
    out = jnp.dot(h, w2_ref[...], preferred_element_type=jnp.float32)
    out = out + b2_ref[...]
    o_ref[...] = out[:, :OUTPUT_DIM].astype(o_ref.dtype)


@functools.partial(jax.jit, static_argnames=("block_batch",))
def fnn_forward(x, w1, b1, w2, b2, *, block_batch=DEFAULT_BLOCK_BATCH):
    """x: (B, 50); w1: (50, 20); b1: (20,) or (1, 20); w2: (20, 10);
    b2: (10,) or (1, 10).  Returns (B, 10) in x.dtype."""
    B = x.shape[0]
    out_dtype = x.dtype
    f32 = jnp.float32

    # Dtype-aware sublane granularity (8 rows f32, 16 bf16, 32 int8/fp8).
    sub = SUBLANE * max(1, 4 // jnp.dtype(x.dtype).itemsize)

    # Tile size: no wrapper-side padding of x / out — Pallas masks the partial
    # boundary block.  Keep the grid at >= 2 (even) steps so the "parallel"
    # batch axis shards across both TensorCores on v7x (no-op on v5e/v6e).
    if B <= sub:
        tb = sub
    else:
        n_steps = max(pl.cdiv(B, block_batch), 2)
        n_steps = 2 * pl.cdiv(n_steps, 2)          # even step count for v7x
        tb = _round_up(pl.cdiv(B, n_steps), sub)
    grid = (pl.cdiv(B, tb),)

    # Weights / biases: zero-pad once to lane-dense shapes (tiny, one-time;
    # grid-invariant blocks stay resident in VMEM across the whole grid).
    w1_p = _pad_to(w1.astype(f32), (INPUT_DIM, HIDDEN_PAD))
    b1_p = _pad_to(b1.astype(f32).reshape(1, -1), (1, HIDDEN_PAD))
    w2_p = _pad_to(w2.astype(f32), (HIDDEN_PAD, OUTPUT_PAD))
    b2_p = _pad_to(b2.astype(f32).reshape(1, -1), (1, OUTPUT_PAD))

    cost = pl.CostEstimate(
        flops=2 * B * (INPUT_DIM * HIDDEN_PAD + HIDDEN_PAD * OUTPUT_DIM),
        transcendentals=2 * B * HIDDEN_PAD,            # exp + log1p per hidden lane
        bytes_accessed=(B * INPUT_DIM * jnp.dtype(x.dtype).itemsize        # x read
                        + B * OUTPUT_DIM * jnp.dtype(out_dtype).itemsize   # out write
                        + (INPUT_DIM * HIDDEN_PAD + HIDDEN_PAD
                           + HIDDEN_PAD * OUTPUT_PAD + OUTPUT_PAD) * 4),   # weights
    )

    return pl.pallas_call(
        _fnn_kernel,
        out_shape=jax.ShapeDtypeStruct((B, OUTPUT_DIM), out_dtype),
        grid=grid,
        in_specs=[
            # Batch-tiled activation: double-buffered / pipelined over grid.
            pl.BlockSpec((tb, INPUT_DIM), lambda i: (i, 0)),
            # Grid-invariant weights / biases: resident in VMEM.
            pl.BlockSpec((INPUT_DIM, HIDDEN_PAD), lambda i: (0, 0)),
            pl.BlockSpec((1, HIDDEN_PAD), lambda i: (0, 0)),
            pl.BlockSpec((HIDDEN_PAD, OUTPUT_PAD), lambda i: (0, 0)),
            pl.BlockSpec((1, OUTPUT_PAD), lambda i: (0, 0)),
        ],
        # Narrow (10-lane) output: contiguous tb*40B writeback per step.
        out_specs=pl.BlockSpec((tb, OUTPUT_DIM), lambda i: (i, 0)),
        compiler_params=pltpu.CompilerParams(
            dimension_semantics=("parallel",),
        ),
        cost_estimate=cost,
    )(x, w1_p, b1_p, w2_p, b2_p)


def fnn_reference(x, w1, b1, w2, b2):
    h = x @ w1 + b1.reshape(1, -1)
    h = jnp.where(h > 20.0, h, jnp.log1p(jnp.exp(jnp.minimum(h, 20.0))))
    return h @ w2 + b2.reshape(1, -1)


if __name__ == "__main__":
    key = jax.random.PRNGKey(0)
    kx, k1, k2, k3, k4 = jax.random.split(key, 5)

    # Small, non-multiple-of-8 batch exercises the masked boundary block.
    batch = 13
    x = jax.random.normal(kx, (batch, INPUT_DIM), jnp.float32)

    # Deterministic init mimicking nn.Linear's uniform(-1/sqrt(fan_in), ...).
    bound1 = 1.0 / jnp.sqrt(INPUT_DIM)
    bound2 = 1.0 / jnp.sqrt(HIDDEN_DIM)
    w1 = jax.random.uniform(k1, (INPUT_DIM, HIDDEN_DIM), jnp.float32, -bound1, bound1)
    b1 = jax.random.uniform(k2, (HIDDEN_DIM,), jnp.float32, -bound1, bound1)
    w2 = jax.random.uniform(k3, (HIDDEN_DIM, OUTPUT_DIM), jnp.float32, -bound2, bound2)
    b2 = jax.random.uniform(k4, (OUTPUT_DIM,), jnp.float32, -bound2, bound2)

    ref = fnn_reference(x, w1, b1, w2, b2)

    # Small block -> multi-step grid with a partial last block.
    out = fnn_forward(x, w1, b1, w2, b2, block_batch=8)
    jax.block_until_ready(out)
    assert out.shape == (batch, OUTPUT_DIM)
    assert jnp.allclose(out, ref, atol=1e-5, rtol=1e-5)

    # Default (large-tile) path.
    out2 = fnn_forward(x, w1, b1, w2, b2)
    jax.block_until_ready(out2)
    assert out2.shape == (batch, OUTPUT_DIM)
    assert jnp.allclose(out2, ref, atol=1e-5, rtol=1e-5)

    print("KERNEL_OK")
</pallas_src>

<mosaic_0001>
module attributes {stable_mosaic.version = 11 : i64} {
  func.func @_fnn_kernel(%arg0: i32, %arg1: memref<8x50xf32, #tpu.memory_space<vmem>>, %arg2: memref<50x128xf32, #tpu.memory_space<vmem>>, %arg3: memref<1x128xf32, #tpu.memory_space<vmem>>, %arg4: memref<128x128xf32, #tpu.memory_space<vmem>>, %arg5: memref<1x128xf32, #tpu.memory_space<vmem>>, %arg6: memref<8x10xf32, #tpu.memory_space<vmem>>) attributes {dimension_semantics = [#tpu.dimension_semantics<parallel>], iteration_bounds = array<i64: 2>, scalar_prefetch = 0 : i64, scratch_operands = 0 : i64, tpu.core_type = #tpu.core_type<tc>, window_params = [{transform_indices = @transform_0, window_bounds = array<i64: 8, 50>}, {pipeline_mode = #tpu.pipeline_mode<synchronous>, transform_indices = @transform_1, window_bounds = array<i64: 50, 128>}, {pipeline_mode = #tpu.pipeline_mode<synchronous>, transform_indices = @transform_2, window_bounds = array<i64: 1, 128>}, {pipeline_mode = #tpu.pipeline_mode<synchronous>, transform_indices = @transform_3, window_bounds = array<i64: 128, 128>}, {pipeline_mode = #tpu.pipeline_mode<synchronous>, transform_indices = @transform_4, window_bounds = array<i64: 1, 128>}, {transform_indices = @transform_5, window_bounds = array<i64: 8, 10>}]} {
    %c0 = arith.constant 0 : index
    %c0_0 = arith.constant 0 : index
    %0 = vector.load %arg1[%c0, %c0_0] : memref<8x50xf32, #tpu.memory_space<vmem>>, vector<8x50xf32>
    %c0_1 = arith.constant 0 : index
    %c0_2 = arith.constant 0 : index
    %1 = vector.load %arg2[%c0_1, %c0_2] : memref<50x128xf32, #tpu.memory_space<vmem>>, vector<50x128xf32>
    %cst = arith.constant dense<0.000000e+00> : vector<8x128xf32>
    %2 = tpu.matmul %0, %1, %cst {dimension_numbers = #tpu.dot_dimension_numbers<[1], [0], [0], [1], [0, 0, 1, 1], [], []>} : vector<8x50xf32>, vector<50x128xf32>, vector<8x128xf32> -> vector<8x128xf32>
    %c0_3 = arith.constant 0 : index
    %c0_4 = arith.constant 0 : index
    %3 = vector.load %arg3[%c0_3, %c0_4] : memref<1x128xf32, #tpu.memory_space<vmem>>, vector<1x128xf32>
    %4 = vector.broadcast %3 : vector<1x128xf32> to vector<8x128xf32>
    %5 = arith.addf %2, %4 : vector<8x128xf32>
    %cst_5 = arith.constant 2.000000e+01 : f32
    %6 = vector.broadcast %cst_5 : f32 to vector<8x128xf32>
    %7 = arith.cmpf ogt, %5, %6 : vector<8x128xf32>
    %cst_6 = arith.constant 2.000000e+01 : f32
    %8 = vector.broadcast %cst_6 : f32 to vector<8x128xf32>
    %9 = arith.minimumf %5, %8 : vector<8x128xf32>
    %10 = math.exp %9 : vector<8x128xf32>
    %11 = math.log1p %10 : vector<8x128xf32>
    %12 = arith.select %7, %5, %11 : vector<8x128xi1>, vector<8x128xf32>
    %c0_7 = arith.constant 0 : index
    %c0_8 = arith.constant 0 : index
    %13 = vector.load %arg4[%c0_7, %c0_8] : memref<128x128xf32, #tpu.memory_space<vmem>>, vector<128x128xf32>
    %cst_9 = arith.constant dense<0.000000e+00> : vector<8x128xf32>
    %14 = tpu.matmul %12, %13, %cst_9 {dimension_numbers = #tpu.dot_dimension_numbers<[1], [0], [0], [1], [0, 0, 1, 1], [], []>} : vector<8x128xf32>, vector<128x128xf32>, vector<8x128xf32> -> vector<8x128xf32>
    %c0_10 = arith.constant 0 : index
    %c0_11 = arith.constant 0 : index
    %15 = vector.load %arg5[%c0_10, %c0_11] : memref<1x128xf32, #tpu.memory_space<vmem>>, vector<1x128xf32>
    %16 = vector.broadcast %15 : vector<1x128xf32> to vector<8x128xf32>
    %17 = arith.addf %14, %16 : vector<8x128xf32>
    %18 = vector.extract_strided_slice %17 {offsets = [0, 0], sizes = [8, 10], strides = [1, 1]} : vector<8x128xf32> to vector<8x10xf32>
    %c0_12 = arith.constant 0 : index
    %c0_13 = arith.constant 0 : index
    %19 = vector.load %arg6[%c0_12, %c0_13] : memref<8x10xf32, #tpu.memory_space<vmem>>, vector<8x10xf32>
    tpu.vector_store %arg6[%c0_12, %c0_13], %18 {strides = array<i32>} : memref<8x10xf32, #tpu.memory_space<vmem>>, vector<8x10xf32>,
    return
  }
  func.func @transform_0(%arg0: i32) -> (i32, i32) {
    %c0_i32 = arith.constant 0 : i32
    %c0_i32_0 = arith.constant 0 : i32
    return %arg0, %c0_i32 : i32, i32
  }
  func.func @transform_1(%arg0: i32) -> (i32, i32) {
    %c0_i32 = arith.constant 0 : i32
    %c0_i32_0 = arith.constant 0 : i32
    %c0_i32_1 = arith.constant 0 : i32
    return %c0_i32, %c0_i32_0 : i32, i32
  }
  func.func @transform_2(%arg0: i32) -> (i32, i32) {
    %c0_i32 = arith.constant 0 : i32
    %c0_i32_0 = arith.constant 0 : i32
    %c0_i32_1 = arith.constant 0 : i32
    return %c0_i32, %c0_i32_0 : i32, i32
  }
  func.func @transform_3(%arg0: i32) -> (i32, i32) {
    %c0_i32 = arith.constant 0 : i32
    %c0_i32_0 = arith.constant 0 : i32
    %c0_i32_1 = arith.constant 0 : i32
    return %c0_i32, %c0_i32_0 : i32, i32
  }
  func.func @transform_4(%arg0: i32) -> (i32, i32) {
    %c0_i32 = arith.constant 0 : i32
    %c0_i32_0 = arith.constant 0 : i32
    %c0_i32_1 = arith.constant 0 : i32
    return %c0_i32, %c0_i32_0 : i32, i32
  }
  func.func @transform_5(%arg0: i32) -> (i32, i32) {
    %c0_i32 = arith.constant 0 : i32
    %c0_i32_0 = arith.constant 0 : i32
    return %arg0, %c0_i32 : i32, i32
  }
}

</mosaic_0001>

<bundles_post_ra>
// kernel: fnn_forward.1
= control target key start
LH: loop header
LB: loop body
LE: loop exit
PB: predicated region body
PF: predicated region fallthrough
CT: control target
= control target key end

     0   :  { %10 = vsyncpa [#allocation3], 0  ;;  %s949_s0 = inlined_call_operand.vmem [shape: f32[13,50], index: 0, kind: input, shape index: {}]   ;;  %s950_s1 = inlined_call_operand.vmem [shape: f32[50,128], index: 1, kind: input, shape index: {}]   ;;  %s951_s2 = inlined_call_operand.vmem [shape: f32[1,128], index: 2, kind: input, shape index: {}]   ;;  %s952_s3 = inlined_call_operand.vmem [shape: f32[128,128], index: 3, kind: input, shape index: {}]   ;;  %s953_s4 = inlined_call_operand.vmem [shape: f32[1,128], index: 4, kind: input, shape index: {}]   ;;  %s954_s5 = inlined_call_operand.hbm [shape: f32[13,10], index: 5, kind: output, shape index: {}]  }
   0x1   :  { %12 = vsyncpa [#allocation3 + $0x1], 0  ;;  %s763_s18 = smov 0   ;;  %s765_s19 = smov 0  }
   0x2   :  { %s767_s20 = smov 0   ;;  %s769_s21 = smov 0  }
   0x3 LB: > { %s784_s22 = sadd.s32 4294967295, %s727_s21   ;;  %s495_s23 = sadd.s32 4294967294, %s727_s21   ;;  %s727_s21 = sphi %s769_s21, %s960_s21   ;;  %s723_s20 = sphi %s767_s20, %s959_s20   ;;  %s719_s19 = sphi %s765_s19, %s958_s19   ;;  %s715_s18 = sphi %s763_s18, %s957_s18  }
   0x4   : > { %s788_s24 = sadd.s32 1, %s727_s21   ;;  %s135_s25 = sadd.s32 1, %s723_s20 }
   0x5   : > { %s132_s26 = ssub.s32 %s727_s21, %s788_s24  ;;  %p145_p0 = scmp.ne.s32.totalorder %s723_s20, %s719_s19 }
   0x6   : > { %p133_p1 = scmp.eq.s32.totalorder %s132_s26, 0  ;;  %p146_p2 = scmp.eq.s32.totalorder %s784_s22, 1 }
   0x7   : > { %p151_p3 = scmp.ne.s32.totalorder %s719_s19, %s715_s18  ;;  %p152_p4 = scmp.eq.s32.totalorder %s495_s23, 1 }
   0x8   : > { %s799_s27 = scalar_select %p133_p1, %s723_s20, %s135_s25  }
   0x9   : > { %p801_p5 = por %p146_p2, %p145_p0  ;;  %p805_p6 = por %p152_p4, %p151_p3 }
   0xa   : > { %p498_p7 = scmp.ge.s32.totalorder %s727_s21, 1  ;;  %p189_p8 = scmp.lt.s32.totalorder %s727_s21, 3 }
   0xc   : > { %p190_p9 = pnand %p498_p7, %p189_p8 }
   0xd   : > { %v221_v0 = vld [vmem:[%s950_s1] sm:$0xff] (!%p190_p9)  ;;  %v222_v1 = vld [vmem:[%s950_s1 + $0x8] sm:$0xff] (!%p190_p9)  ;;  %v223_v2 = vld [vmem:[%s950_s1 + $0x10] sm:$0xff] (!%p190_p9)  ;;  %v729_v3 = vmov (!%p190_p9), 0.0|0.0   ;;  %p216_p10 = scmp.lt.s32.totalorder (!%p190_p9), %s784_s22, 1  ;;  %vm730_vm0 = vmmov (!%p190_p9), 0  }
   0xe   : > { %193 = sbr.rel (%p190_p9) target bundleno = 503 (0x1f7), region = 40  ;;  %586 = vmatprep.subr.bf16.mxu0 (!%p190_p9), %v729_v3  ;;  %v587_v4 = vpack.c.bf16 (!%p190_p9), %v222_v1, %v221_v0  ;;  %v224_v5 = vld [vmem:[%s950_s1 + $0x18] sm:$0xff] (!%p190_p9)  ;;  %595 = vmatprep.subr.bf16.mxu1 (!%p190_p9), %v729_v3  ;;  %v731_v6 = vmov (!%p190_p9), 0.0   ;;  %v225_v8 = vld [vmem:[%s950_s1 + $0x20] sm:$0xff] (!%p190_p9)  ;;  %v226_v9 = vld [vmem:[%s950_s1 + $0x28] sm:$0xff] (!%p190_p9)  ;;  %vm239_vm1 = vcmask (!%p190_p9), 1041408  }
   0xf   : > { %548 = vmatprep.mubr.msk.f32.mxu0 (!%p190_p9), %vm730_vm0, %v731_v6  ;;  %583 = vmatprep.mubr.msk.f32.mxu1 (!%p190_p9), %vm730_vm0, %v731_v6  ;;  %v590_v7 = vpack.c.bf16 (!%p190_p9), %v224_v5, %v223_v2  ;;  %v593_v10 = vpack.c.bf16 (!%p190_p9), %v226_v9, %v225_v8  ;;  %v227_v11 = vld [vmem:[%s950_s1 + $0x30] sm:$0x3] (!%p190_p9)  ;;  %vm235_vm2 = vcmask (!%p190_p9), 408576   ;;  %v327_v13 = vld [vmem:[%s952_s3] sm:$0xff] (!%p190_p9)  ;;  %v328_v14 = vld [vmem:[%s952_s3 + $0x8] sm:$0xff] (!%p190_p9)  ;;  %s213_s10 = sand.u32 (!%p190_p9), 1, %s719_s19  }
  0x10   : > { %588 = vmatpush3.bf16.msra.mxu0 (!%p190_p9), %v587_v4  ;;  %v596_v15 = vpack.c.bf16 (!%p190_p9), %v328_v14, %v327_v13  ;;  %v329_v16 = vld [vmem:[%s952_s3 + $0x10] sm:$0xff] (!%p190_p9)  ;;  %v330_v17 = vld [vmem:[%s952_s3 + $0x18] sm:$0xff] (!%p190_p9)  ;;  %v331_v19 = vld [vmem:[%s952_s3 + $0x20] sm:$0xff] (!%p190_p9)  ;;  %s499_s11 = sshll.u32 (!%p190_p9), %s213_s10, 3  ;;  %s506_s14 = sshll.u32 (!%p190_p9), %s784_s22, 7  ;;  %vm420_vm5 = vcmask (!%p190_p9), 80896  }
  0x11   : > { %589 = vmatprep.subr.bf16.mxu0 (!%p190_p9), %v729_v3  ;;  %v599_v18 = vpack.c.bf16 (!%p190_p9), %v330_v17, %v329_v16  ;;  %v332_v20 = vld [vmem:[%s952_s3 + $0x28] sm:$0xff] (!%p190_p9)  ;;  %v333_v22 = vld [vmem:[%s952_s3 + $0x30] sm:$0xff] (!%p190_p9)  ;;  %v334_v23 = vld [vmem:[%s952_s3 + $0x38] sm:$0xff] (!%p190_p9)  ;;  %s215_s15 = scalar_lea.vmem (!%p190_p9), [#allocation2], %s499_s11  ;;  %s907_s25 = scalar_lea.hbm (!%p190_p9), %s954_s5, %s506_s14 }
  0x12   : > { %597 = vmatpush3.bf16.msra.mxu1 (!%p190_p9), %v596_v15  ;;  %v602_v21 = vpack.c.bf16 (!%p190_p9), %v332_v20, %v331_v19  ;;  %v605_v24 = vpack.c.bf16 (!%p190_p9), %v334_v23, %v333_v22  ;;  %v335_v25 = vld [vmem:[%s952_s3 + $0x40] sm:$0xff] (!%p190_p9)  ;;  %v336_v26 = vld [vmem:[%s952_s3 + $0x48] sm:$0xff] (!%p190_p9)  ;;  %v337_v28 = vld [vmem:[%s952_s3 + $0x50] sm:$0xff] (!%p190_p9)  ;;  %s436_s16 = sshll.u32 (!%p190_p9), %s215_s15, 4  ;;  %s423_s26 = scalar_lea.sflag (!%p190_p9), [#allocation3], %s213_s10  ;;  %s909_s16 = int_to_ptr.vmem [resolvable:$true] %s436_s16 }
  0x13   : > { %598 = vmatprep.subr.bf16.mxu1 (!%p190_p9), %v729_v3  ;;  %v608_v27 = vpack.c.bf16 (!%p190_p9), %v336_v26, %v335_v25  ;;  %v338_v29 = vld [vmem:[%s952_s3 + $0x58] sm:$0xff] (!%p190_p9)  ;;  %v339_v31 = vld [vmem:[%s952_s3 + $0x60] sm:$0xff] (!%p190_p9)  ;;  %v340_v32 = vld [vmem:[%s952_s3 + $0x68] sm:$0xff] (!%p190_p9) }
  0x14   : > { %591 = vmatpush3.bf16.msra.mxu0 (!%p190_p9), %v590_v7  ;;  %v611_v30 = vpack.c.bf16 (!%p190_p9), %v338_v29, %v337_v28  ;;  %v614_v33 = vpack.c.bf16 (!%p190_p9), %v340_v32, %v339_v31  ;;  %v341_v34 = vld [vmem:[%s952_s3 + $0x70] sm:$0xff] (!%p190_p9)  ;;  %v342_v35 = vld [vmem:[%s952_s3 + $0x78] sm:$0xff] (!%p190_p9)  ;;  %v501_v37 = vld [vmem:[%s951_s2] ss:$0 sm:$0xff] (!%p190_p9) }
  0x15   : > { %s217_s13 = scalar_select %p216_p10, %s784_s22, 1  ;;  %592 = vmatprep.subr.bf16.mxu0 %v729_v3  ;;  %v617_v36 = vpack.c.bf16 %v342_v35, %v341_v34  ;;  %v504_v53 = vld [vmem:[%s953_s4] ss:$0 sm:$0xff] }
  0x16   : > { %600 = vmatpush3.bf16.msra.mxu1 %v599_v18  ;;  %s732_s22 = smov [#allocation2]  }
  0x17   : > { %s500_s23 = sshll.u32 %s217_s13, 3  ;;  %601 = vmatprep.subr.bf16.mxu1 %v729_v3  ;;  %s669_s6 = sshll.u32 %s732_s22, 4  ;;  %s670_s6 = int_to_ptr.vmem [resolvable:$false] %s669_s6 }
  0x18   : > { %s219_s30 = scalar_lea.vmem %s949_s0, %s500_s23  ;;  %594 = vmatpush3.bf16.msra.mxu0 %v593_v10  ;;  %s671_s7 = scalar_lea.vmem %s670_s6, 256 }
  0x19   : > { %546 = vmatprep.subr.mxu0 %v731_v6  ;;  %v220_v12 = vld [vmem:[%s219_s30] sm:$0xff]  ;;  %s665_s30 = scalar_lea.vmem %s909_s16, 128  ;;  %p672_p0 = scmp.lt.s32.totalorder %s909_s16, %s670_s6 }
  0x1a   : > { %603 = vmatpush3.bf16.msra.mxu1 %v602_v21  ;;  %p666_p11 = scmp.ne.s32.totalorder %s909_s16, %s665_s30  ;;  %p673_p1 = scmp.lt.s32.totalorder %s671_s7, %s665_s30 }
  0x1b   : > { %604 = vmatprep.subr.bf16.mxu1 %v729_v3 }
  0x1c   : > { %547 = vmatpush3.msk.msra.mxu0 %vm239_vm1, %v227_v11  ;;  %p667_p12 = pnand %p666_p11, %p801_p5  ;;  %p674_p2 = por %p673_p1, %p672_p0 }
  0x1d   : > { %549 = vmatmul.mubr.msk.f32.vlgmr.msra.gmra.mrb[0].mxu0 %vm235_vm2, %v220_v12 }
  0x1e   : > { %606 = vmatpush3.bf16.msra.mxu1 %v605_v24  ;;  %p668_p13 = pneg %p667_p12 }
  0x1f   : > { %607 = vmatprep.subr.bf16.mxu1 %v729_v3 }
  0x20   : > { %p675_p3 = pnand %p674_p2, %p668_p13 }
  0x22   : > { %609 = vmatpush3.bf16.msra.mxu1 %v608_v27 }
  0x23   : > { %610 = vmatprep.subr.bf16.mxu1 %v729_v3 }
  0x26   : > { %612 = vmatpush3.bf16.msra.mxu1 %v611_v30 }
  0x27   : > { %613 = vmatprep.subr.bf16.mxu1 %v729_v3 }
  0x2a   : > { %615 = vmatpush3.bf16.msra.mxu1 %v614_v33 }
  0x2b   : > { %616 = vmatprep.subr.bf16.mxu1 %v729_v3 }
  0x2e   : > { %618 = vmatpush3.bf16.msra.mxu1 %v617_v36 }
  0xf0   : > { %v309_v38 = vpop.f32.mrb[0].mxu0 }
  0xf1   : > { %v310_v39 = vadd.f32 %v501_v37, %v309_v38  ;;  %v550_v40 = vpop.f32.mrb[1].mxu0 }
  0xf3   : > { %v314_v41 = vmin.f32 %v310_v39, 20.0  ;;  %vm313_vm4 = vcmp.gt.f32.partialorder %v310_v39, 20.0 }
  0xf5   : > { %v315_v42 = vmul.f32 1.442695, %v314_v41 }
  0xf7   : > { %661 = vpow2.f32 %v315_v42 }
 0x101   : > { %v662_v43 = vpop.eup %661 }
 0x102   : > { %v317_v44 = vadd.f32 1.0, %v662_v43  ;;  %v320_v45 = vmul.f32 -0.5, %v662_v43  ;;  %v323_v47 = vand.u32 2147483647, %v662_v43 }
 0x104   : > { %663 = vlog2.f32 %v317_v44  ;;  %v321_v46 = vadd.f32 1.0, %v320_v45  ;;  %vm324_vm3 = vcmp.lt.f32.partialorder %v323_v47, 0.0004427343 }
 0x106   : > { %v322_v50 = vmul.f32 %v662_v43, %v321_v46 }
 0x10e   : > { %v664_v48 = vpop.eup %663 }
 0x10f   : > { %v319_v49 = vmul.f32 0.6931472, %v664_v48 }
 0x111   : > { %v325_v51 = vsel %vm324_vm3, %v322_v50, %v319_v49 }
 0x112   : > { %v326_v52 = vsel %vm313_vm4, %v310_v39, %v325_v51 }
 0x113   : > { %584 = vmatmul.mubr.f32.vlgmr.msra.gmra.mrb[0].mxu1 %v326_v52 }
 0x1e6   : > { %v416_v54 = vpop.f32.mrb[0].mxu1 }
 0x1e7   : > { %v417_v55 = vadd.f32 %v504_v53, %v416_v54  ;;  %v585_v56 = vpop.f32.mrb[1].mxu1 }
 0x1e9   : > { %421 = vst.msk [vmem:[%s215_s15] sm:$0xff] %vm420_vm5, %v417_v55 }
 0x1ea   : > { %678 = shalt.err (!%p675_p3)
}
 0x1eb   : > { %s679_s8 = scalar_lea.hbm %s907_s25, 128  ;;  %s683_s11 = scalar_lea.hbm %s954_s5, 256 }
 0x1ec   : > { %p680_p4 = scmp.ne.s32.totalorder %s907_s25, %s679_s8  ;;  %p684_p9 = scmp.lt.u32.totalorder %s907_s25, %s954_s5 }
 0x1ed   : > { %p685_p10 = scmp.lt.u32.totalorder %s683_s11, %s679_s8  ;;  %p687_p12 = scmp.lt.u32.totalorder %s679_s8, %s907_s25 }
 0x1ee   : > { %p681_p7 = pnand %p680_p4, %p801_p5 }
 0x1ef   : > { %p686_p11 = por %p685_p10, %p684_p9 }
 0x1f0   : > { %p682_p8 = pneg %p681_p7 }
 0x1f1   : > { %p688_p13 = por %p687_p12, %p686_p11 }
 0x1f3   : > { %p689_p0 = pnand %p688_p13, %p682_p8 }
 0x1f5   : > { %692 = shalt.err (!%p689_p0)
}
 0x1f6   : > { %619 = dma.vmem_to_hbm [thread:$0]  (%p801_p5), %s909_s16, 128, %s907_s25, %s423_s26  }
 0x1f7 PF: > { %p625_p1 = scmp.ge.s32.totalorder %s727_s21, 2  ;;  %s448_s14 = sand.u32 1, %s715_s18  }
 0x1f8   : > { %s449_s15 = scalar_lea.sflag [#allocation3], %s448_s14 }
 0x1f9   : > { %p622_p2 = pnand %p625_p1, %p805_p6 }
 0x1fb   : > { %710 = dma.done.wait (!%p622_p2), %s449_s15, 128  }
 0x1fc   : > { %712 = vsyncadd (!%p622_p2), %s449_s15, 4294967168  ;;  %p15_p3 = scmp.ge.s32.totalorder %s788_s24, 4   ;;  %s957_s18 = smov %s719_s19 }
 0x1fd   : > { %s958_s19 = smov %s723_s20  ;;  %s959_s20 = smov %s799_s27 }
 0x1fe   : > { %s960_s21 = smov %s788_s24  ;;  %17 = sbr.rel (!%p15_p3) target bundleno = 3 (0x3), region = 75 }
 0x205   :  { %454 = vsyncpa [#allocation3], 1 }
 0x206   :  { %456 = vsyncpa [#allocation3 + $0x1], 1 }

</bundles_post_ra>
